<compile_context>
chip_gen: v7x
topology: tpu7x:2x2x1
jax: 0.10.0
libtpu: 0.0.40
codegen_flags: <defaults>
</compile_context>

<pallas_src>
import functools

import jax
import jax.numpy as jnp
from jax.experimental import pallas as pl
from jax.experimental.pallas import tpu as pltpu


def soft_attention_kernel(x_ref, w1_ref, b1_ref, w2_ref, soft_ref, attw_ref):
    # Shapes recovered from the output refs (TB = batch tile, T = steps).
    TB, D = soft_ref.shape
    T = attw_ref.shape[0] // TB

    x2d = x_ref[...]                                        # (TB*T, D), native dtype

    # Linear1 + ReLU: one MXU matmul over all (b, t) rows, f32 accumulation.
    h = jnp.dot(x2d, w1_ref[...], preferred_element_type=jnp.float32)
    h = jnp.maximum(h + b1_ref[...].astype(jnp.float32), 0.0)      # (TB*T, H) f32

    # Linear2 (output width 1): VPU multiply + lane reduce instead of an N=1
    # MXU matmul.  b2 is omitted: softmax is shift-invariant and the raw
    # scores are never output, so it is mathematically dead.
    s = jnp.sum(h * w2_ref[...].astype(jnp.float32),
                axis=-1, keepdims=True)                     # (TB*T, 1) f32

    # Softmax over T on a sublane-grouped (TB, T, 1) view -- the scores never
    # leave the column layout, so there is no lane<->sublane relayout.
    s3 = s.reshape(TB, T, 1)
    m = jnp.max(s3, axis=1, keepdims=True)                  # (TB, 1, 1)
    e = jnp.exp(s3 - m)
    denom = jnp.sum(e, axis=1, keepdims=True)               # (TB, 1, 1)
    # exact reciprocal (approx=True perturbs weights ~1e-3; test needs 1e-5)
    wgt = (e * pl.reciprocal(denom, approx=False)).reshape(TB * T, 1)
    attw_ref[...] = wgt.astype(attw_ref.dtype)              # flat (TB*T, 1) column

    # Weighted sum over T: broadcast-mul + sublane-group reduce (no MXU).
    # wgt is f32, so the product and accumulation stay f32 even for bf16 x.
    weighted = wgt * x2d                                    # (TB*T, D) f32
    soft = jnp.sum(weighted.reshape(TB, T, D), axis=1)      # (TB, D) f32
    soft_ref[...] = soft.astype(soft_ref.dtype)


def _vmem_capacity_bytes():
    """Physical VMEM of the attached TPU; conservative fallback if unknown."""
    try:
        cap = int(pltpu.get_tpu_info().vmem_capacity_bytes)
        if cap > 0:
            return cap
    except Exception:
        pass
    return 64 * 1024 * 1024          # v7x lower bound -- safe on every generation


def _pick_batch_tile(B, T, D, H, x_itemsize, vmem_budget_bytes):
    """Largest batch tile TB whose per-block working set fits the VMEM budget.

    Per batch row of the tile:
      2 * T*D*x_itemsize   double-buffered x tile
      + T*H*4              Linear1 activations (f32)
      + T*D*4              weighted-sum temporary (f32)
      + 2*D*4 + 2*T*4      double-buffered output tiles
    Rounded down to a multiple of 8 (sublane alignment of the (TB, D) and
    (TB*T, 1) out blocks when tiling) and capped so large B splits into >= 2
    grid blocks -- dimension_semantics=("parallel",) then shards the batch
    across v7x's two TensorCores.
    """
    per_row = (2 * T * D * x_itemsize + T * H * 4 + T * D * 4
               + 2 * D * 4 + 2 * T * 4)
    tb = int(vmem_budget_bytes // max(per_row, 1))
    if tb >= B:
        return B                      # single block: block dims == array dims
    half = (pl.cdiv(B, 2) // 8) * 8   # keep >= 2 blocks for megacore sharding
    if half >= 8:
        tb = min(tb, half)
    return max(8, (tb // 8) * 8)


@functools.partial(jax.jit, static_argnames=("batch_tile", "vmem_limit_bytes"))
def _soft_attention_call(x, w1, b1, w2, batch_tile, vmem_limit_bytes):
    B, T, D = x.shape
    H = w1.shape[1]
    TB = batch_tile

    # Layout plumbing done in the wrapper (free in HBM, row-major):
    x2d = x.reshape(B * T, D)          # collapse (B, T) -> rows
    w2_row = w2.reshape(1, H)          # (H, 1) -> (1, H) for the lane reduce

    grid = (pl.cdiv(B, TB),)
    grid_spec = pl.GridSpec(
        grid=grid,
        in_specs=[
            pl.BlockSpec((TB * T, D), lambda i: (i, 0)),    # x rows
            pl.BlockSpec((D, H), lambda i: (0, 0)),         # W1
            pl.BlockSpec((1, H), lambda i: (0, 0)),         # b1
            pl.BlockSpec((1, H), lambda i: (0, 0)),         # W2 as a row
        ],
        out_specs=[
            pl.BlockSpec((TB, D), lambda i: (i, 0)),        # soft
            pl.BlockSpec((TB * T, 1), lambda i: (i, 0)),    # weights, flat column
        ],
    )

    itemsize = x.dtype.itemsize
    cost = pl.CostEstimate(
        flops=2 * B * T * D * H + 2 * B * T * H + 3 * B * T * D,
        transcendentals=B * T,
        bytes_accessed=(B * T * D * itemsize                # x in
                        + D * H * w1.dtype.itemsize         # W1
                        + H * b1.dtype.itemsize             # b1
                        + H * w2.dtype.itemsize             # W2
                        + B * D * itemsize                  # soft out
                        + B * T * 4),                       # weights out
    )

    soft, attw_flat = pl.pallas_call(
        soft_attention_kernel,
        grid_spec=grid_spec,
        out_shape=(
            jax.ShapeDtypeStruct((B, D), x.dtype),
            jax.ShapeDtypeStruct((B * T, 1), jnp.float32),
        ),
        compiler_params=pltpu.CompilerParams(
            dimension_semantics=("parallel",),
            vmem_limit_bytes=vmem_limit_bytes),
        cost_estimate=cost,
    )(x2d, w1, b1, w2_row)

    # (B*T, 1) -> (B, T): a row-major reshape in HBM, free.
    return soft, attw_flat.reshape(B, T)


def soft_attention(x, w1, b1, w2, b2=None, batch_tile=None):
    """x: (B, T, D); w1: (D, H); b1: (1, H); w2: (H, 1); b2 accepted but unused.

    Returns (soft[B, D], weights[B, T]).
    """
    B, T, D = x.shape
    H = w1.shape[1]
    # b2 adds the same scalar to every score; softmax is invariant to that and
    # raw scores are never returned, so it is dropped from the kernel operands.
    del b2

    vmem_phys = _vmem_capacity_bytes()
    if batch_tile is None:
        TB = _pick_batch_tile(B, T, D, H, x.dtype.itemsize, vmem_phys // 4)
    elif int(batch_tile) >= B:
        TB = B
    else:
        TB = max(8, (int(batch_tile) // 8) * 8)   # (8,128) sublane alignment

    return _soft_attention_call(x, w1, b1, w2, TB, int(vmem_phys // 2))


def soft_attention_ref(x, w1, b1, w2, b2):
    """Pure-JAX reference mirroring the PyTorch forward (b2 included)."""
    h = jnp.maximum(jnp.einsum('btd,dh->bth', x, w1) + b1[0], 0.0)
    scores = jnp.einsum('bth,ho->bto', h, w2)[..., 0] + b2[0, 0]   # (B, T)
    w = jax.nn.softmax(scores, axis=1)
    soft = jnp.einsum('bt,btd->bd', w, x)
    return soft, w


if __name__ == "__main__":
    # Small shapes consistent with the module: a list of T feature vectors of
    # size D per batch element, hidden size H for the attention MLP.
    B, T, D, H = 2, 8, 32, 16

    key = jax.random.PRNGKey(0)
    kx, k1, k2, k3, k4 = jax.random.split(key, 5)

    # Stacked inputs (the "list" of T tensors of shape (B, D)).
    x = jax.random.normal(kx, (B, T, D), dtype=jnp.float32)

    # Deterministic parameter init (synthetic; not a checkpoint load).
    # TODO(synk): only the type='det' path is implemented; the Bayesian layer
    # variants (mc / vd / bbb) of bl.Linear have no deterministic forward here.
    w1 = (jax.random.normal(k1, (D, H), dtype=jnp.float32) / jnp.sqrt(D))
    b1 = (0.01 * jax.random.normal(k2, (1, H), dtype=jnp.float32))
    w2 = (jax.random.normal(k3, (H, 1), dtype=jnp.float32) / jnp.sqrt(H))
    b2 = (0.01 * jax.random.normal(k4, (1, 1), dtype=jnp.float32))

    soft, attw = soft_attention(x, w1, b1, w2, b2)
    jax.block_until_ready((soft, attw))

    soft_r, attw_r = soft_attention_ref(x, w1, b1, w2, b2)
    assert jnp.allclose(soft, soft_r, atol=1e-5, rtol=1e-5), "soft mismatch"
    assert jnp.allclose(attw, attw_r, atol=1e-5, rtol=1e-5), "weights mismatch"
    assert jnp.allclose(jnp.sum(attw, axis=1), 1.0, atol=1e-5), \
        "softmax not normalized"

    print("KERNEL_OK")
</pallas_src>

<mosaic_0001>
module attributes {stable_mosaic.version = 11 : i64} {
  func.func @soft_attention_kernel(%arg0: i32, %arg1: memref<16x32xf32, #tpu.memory_space<vmem>>, %arg2: memref<32x16xf32, #tpu.memory_space<vmem>>, %arg3: memref<1x16xf32, #tpu.memory_space<vmem>>, %arg4: memref<1x16xf32, #tpu.memory_space<vmem>>, %arg5: memref<2x32xf32, #tpu.memory_space<vmem>>, %arg6: memref<16x1xf32, #tpu.memory_space<vmem>>) attributes {dimension_semantics = [#tpu.dimension_semantics<parallel>], iteration_bounds = array<i64: 1>, scalar_prefetch = 0 : i64, scratch_operands = 0 : i64, tpu.core_type = #tpu.core_type<tc>, window_params = [{transform_indices = @transform_0, window_bounds = array<i64: 16, 32>}, {pipeline_mode = #tpu.pipeline_mode<synchronous>, transform_indices = @transform_1, window_bounds = array<i64: 32, 16>}, {pipeline_mode = #tpu.pipeline_mode<synchronous>, transform_indices = @transform_2, window_bounds = array<i64: 1, 16>}, {pipeline_mode = #tpu.pipeline_mode<synchronous>, transform_indices = @transform_3, window_bounds = array<i64: 1, 16>}, {transform_indices = @transform_4, window_bounds = array<i64: 2, 32>}, {transform_indices = @transform_5, window_bounds = array<i64: 16, 1>}]} {
    %c0 = arith.constant 0 : index
    %c0_0 = arith.constant 0 : index
    %0 = vector.load %arg1[%c0, %c0_0] : memref<16x32xf32, #tpu.memory_space<vmem>>, vector<16x32xf32>
    %c0_1 = arith.constant 0 : index
    %c0_2 = arith.constant 0 : index
    %1 = vector.load %arg2[%c0_1, %c0_2] : memref<32x16xf32, #tpu.memory_space<vmem>>, vector<32x16xf32>
    %cst = arith.constant dense<0.000000e+00> : vector<16x16xf32>
    %2 = tpu.matmul %0, %1, %cst {dimension_numbers = #tpu.dot_dimension_numbers<[1], [0], [0], [1], [0, 0, 1, 1], [], []>} : vector<16x32xf32>, vector<32x16xf32>, vector<16x16xf32> -> vector<16x16xf32>
    %c0_3 = arith.constant 0 : index
    %c0_4 = arith.constant 0 : index
    %3 = vector.load %arg3[%c0_3, %c0_4] : memref<1x16xf32, #tpu.memory_space<vmem>>, vector<1x16xf32>
    %4 = vector.broadcast %3 : vector<1x16xf32> to vector<16x16xf32>
    %5 = arith.addf %2, %4 : vector<16x16xf32>
    %cst_5 = arith.constant 0.000000e+00 : f32
    %6 = vector.broadcast %cst_5 : f32 to vector<16x16xf32>
    %7 = arith.maximumf %5, %6 : vector<16x16xf32>
    %c0_6 = arith.constant 0 : index
    %c0_7 = arith.constant 0 : index
    %8 = vector.load %arg4[%c0_6, %c0_7] : memref<1x16xf32, #tpu.memory_space<vmem>>, vector<1x16xf32>
    %9 = vector.broadcast %8 : vector<1x16xf32> to vector<16x16xf32>
    %10 = arith.mulf %7, %9 : vector<16x16xf32>
    %cst_8 = arith.constant dense<0.000000e+00> : vector<16xf32>
    %11 = vector.multi_reduction <add>, %10, %cst_8 [1] : vector<16x16xf32> to vector<16xf32>
    %12 = vector.shape_cast %11 : vector<16xf32> to vector<16x1xf32>
    %13 = vector.shape_cast %12 : vector<16x1xf32> to vector<2x8x1xf32>
    %cst_9 = arith.constant dense<0xFF800000> : vector<2x1xf32>
    %14 = vector.multi_reduction <maximumf>, %13, %cst_9 [1] : vector<2x8x1xf32> to vector<2x1xf32>
    %15 = vector.shape_cast %14 : vector<2x1xf32> to vector<2x1x1xf32>
    %16 = vector.broadcast %15 : vector<2x1x1xf32> to vector<2x8x1xf32>
    %17 = arith.subf %13, %16 : vector<2x8x1xf32>
    %18 = math.exp %17 : vector<2x8x1xf32>
    %cst_10 = arith.constant dense<0.000000e+00> : vector<2x1xf32>
    %19 = vector.multi_reduction <add>, %18, %cst_10 [1] : vector<2x8x1xf32> to vector<2x1xf32>
    %20 = vector.shape_cast %19 : vector<2x1xf32> to vector<2x1x1xf32>
    %21 = tpu.reciprocal %20 : vector<2x1x1xf32> -> vector<2x1x1xf32>
    %22 = vector.broadcast %21 : vector<2x1x1xf32> to vector<2x8x1xf32>
    %23 = arith.mulf %18, %22 : vector<2x8x1xf32>
    %24 = vector.shape_cast %23 : vector<2x8x1xf32> to vector<16x1xf32>
    %c0_11 = arith.constant 0 : index
    %c0_12 = arith.constant 0 : index
    %25 = vector.load %arg6[%c0_11, %c0_12] : memref<16x1xf32, #tpu.memory_space<vmem>>, vector<16x1xf32>
    tpu.vector_store %arg6[%c0_11, %c0_12], %24 {strides = array<i32>} : memref<16x1xf32, #tpu.memory_space<vmem>>, vector<16x1xf32>,
    %26 = vector.broadcast %24 : vector<16x1xf32> to vector<16x32xf32>
    %27 = arith.mulf %26, %0 : vector<16x32xf32>
    %28 = vector.shape_cast %27 : vector<16x32xf32> to vector<2x8x32xf32>
    %cst_13 = arith.constant dense<0.000000e+00> : vector<2x32xf32>
    %29 = vector.multi_reduction <add>, %28, %cst_13 [1] : vector<2x8x32xf32> to vector<2x32xf32>
    %c0_14 = arith.constant 0 : index
    %c0_15 = arith.constant 0 : index
    %30 = vector.load %arg5[%c0_14, %c0_15] : memref<2x32xf32, #tpu.memory_space<vmem>>, vector<2x32xf32>
    tpu.vector_store %arg5[%c0_14, %c0_15], %29 {strides = array<i32>} : memref<2x32xf32, #tpu.memory_space<vmem>>, vector<2x32xf32>,
    return
  }
  func.func @transform_0(%arg0: i32) -> (i32, i32) {
    %c0_i32 = arith.constant 0 : i32
    %c0_i32_0 = arith.constant 0 : i32
    return %arg0, %c0_i32 : i32, i32
  }
  func.func @transform_1(%arg0: i32) -> (i32, i32) {
    %c0_i32 = arith.constant 0 : i32
    %c0_i32_0 = arith.constant 0 : i32
    %c0_i32_1 = arith.constant 0 : i32
    return %c0_i32, %c0_i32_0 : i32, i32
  }
  func.func @transform_2(%arg0: i32) -> (i32, i32) {
    %c0_i32 = arith.constant 0 : i32
    %c0_i32_0 = arith.constant 0 : i32
    %c0_i32_1 = arith.constant 0 : i32
    return %c0_i32, %c0_i32_0 : i32, i32
  }
  func.func @transform_3(%arg0: i32) -> (i32, i32) {
    %c0_i32 = arith.constant 0 : i32
    %c0_i32_0 = arith.constant 0 : i32
    %c0_i32_1 = arith.constant 0 : i32
    return %c0_i32, %c0_i32_0 : i32, i32
  }
  func.func @transform_4(%arg0: i32) -> (i32, i32) {
    %c0_i32 = arith.constant 0 : i32
    %c0_i32_0 = arith.constant 0 : i32
    return %arg0, %c0_i32 : i32, i32
  }
  func.func @transform_5(%arg0: i32) -> (i32, i32) {
    %c0_i32 = arith.constant 0 : i32
    %c0_i32_0 = arith.constant 0 : i32
    return %arg0, %c0_i32 : i32, i32
  }
}

</mosaic_0001>

<bundles_post_ra>
// kernel: _soft_attention_call.1
= control target key start
LH: loop header
LB: loop body
LE: loop exit
PB: predicated region body
PF: predicated region fallthrough
CT: control target
= control target key end

     0   :  { %vm33_vm0 = vcmask 261120   ;;  %s358_s0 = inlined_call_operand.vmem [shape: f32[16,32], index: 0, kind: input, shape index: {}]   ;;  %s359_s1 = inlined_call_operand.vmem [shape: f32[32,16], index: 1, kind: input, shape index: {}]   ;;  %s360_s2 = inlined_call_operand.vmem [shape: f32[1,16], index: 2, kind: input, shape index: {}]   ;;  %s361_s3 = inlined_call_operand.vmem [shape: f32[1,16], index: 3, kind: input, shape index: {}]   ;;  %s362_s4 = inlined_call_operand.hbm [shape: f32[2,32], index: 4, kind: output, shape index: {0}]   ;;  %s363_s5 = inlined_call_operand.vmem [shape: f32[16,1], index: 5, kind: output, shape index: {1}]  }
   0x1   :  { %v22_v0 = vld [vmem:[%s359_s1] sm:$0xff]  ;;  %v23_v1 = vld [vmem:[%s359_s1 + $0x8] sm:$0xff]  ;;  %v24_v2 = vld [vmem:[%s359_s1 + $0x10] sm:$0xff] }
   0x2   :  { %v232_v3 = vpack.c.bf16 %v23_v1, %v22_v0  ;;  %v25_v4 = vld [vmem:[%s359_s1 + $0x18] sm:$0xff]  ;;  %v319_v5 = vld [vmem:[%s358_s0] sm:$0xff] }
   0x3   :  { %v236_v6 = vpack.c.bf16 %v25_v4, %v24_v2  ;;  %229 = vmatprep.mubr.msk.f32.mxu0 %vm33_vm0, %v319_v5 }
   0x4   :  { %11 = vsyncpa [#allocation3], 0  ;;  %233 = vmatprep.subr.bf16.mxu0 %v232_v3  ;;  %v326_v7 = vld [vmem:[%s358_s0 + $0x8] sm:$0xff]  ;;  %v211_v8 = vld [vmem:[%s360_s2] ss:$0 sm:$0xff]  ;;  %vm126_vm1 = vcmask 130048  }
   0x5   :  { %235 = vmatpush3.bf16.msra.mxu0 %v232_v3  ;;  %v214_v13 = vld [vmem:[%s361_s3] ss:$0 sm:$0xff]  ;;  %vm167_vm2 = vcmask 7168   ;;  %s273_s9 = smov [#allocation2]   ;;  %vm188_vm3 = vcmask 1041409   ;;  %vm191_vm4 = vcmask 254976  }
   0x6   :  { %237 = vmatprep.subr.bf16.mxu0 %v236_v6  ;;  %s199_s10 = sshll.u32 %s273_s9, 4  ;;  %s200_s10 = int_to_ptr.vmem [resolvable:$true] %s199_s10 }
   0x7   :  { %p254_p1 = scmp.lt.s32.totalorder %s200_s10, %s200_s10 }
   0x9   :  { %239 = vmatpush3.bf16.msra.mxu0 %v236_v6 }
   0xc   :  { %230 = vmatmul.mubr.msk.f32.vlgmr.msra.gmra.mrb[0].mxu0 %vm33_vm0, %v326_v7 }
  0xdf   :  { %v231_v9 = vpop.f32.mrb[0].mxu0 }
  0xe0   :  { %v112_v10 = vadd.f32 %v231_v9, %v211_v8  ;;  %v106_v11 = vpop.f32.mrb[1].mxu0 }
  0xe1   :  { %v107_v12 = vadd.f32 %v211_v8, %v106_v11 }
  0xe2   :  { %v116_v14 = vmax.f32 %v112_v10, 0.0 }
  0xe3   :  { %v115_v15 = vmax.f32 %v107_v12, 0.0 }
  0xe4   :  { %v125_v18 = vmul.f32 %v214_v13, %v116_v14 }
  0xe5   :  { %v124_v16 = vmul.f32 %v214_v13, %v115_v15 }
  0xe6   :  { %v130_v19 = vsel %vm126_vm1, %v125_v18, 0.0 }
  0xe7   :  { %v127_v17 = vsel %vm126_vm1, %v124_v16, 0.0 }
  0xe8   :  { %128 = vadd.xlane.f32.xlu0 %v127_v17 }
  0xec   :  { %131 = vadd.xlane.f32.xlu0 %v130_v19 }
 0x175   :  { %v129_v20 = vpop.xlane.xlu0 %128 }
 0x176   :  { %v133_v21 = vrot.slane %v129_v20, 4 }
 0x178   :  { %v134_v22 = vmax.f32 %v129_v20, %v133_v21 }
 0x179   :  { %v132_v23 = vpop.xlane.xlu0 %131 }
 0x17a   :  { %v135_v24 = vrot.slane %v134_v22, 2  ;;  %v139_v25 = vrot.slane %v132_v23, 4 }
 0x17c   :  { %v136_v26 = vmax.f32 %v134_v22, %v135_v24  ;;  %v140_v27 = vmax.f32 %v132_v23, %v139_v25 }
 0x17e   :  { %v137_v28 = vrot.slane %v136_v26, 1  ;;  %v141_v29 = vrot.slane %v140_v27, 2 }
 0x180   :  { %v138_v30 = vmax.f32 %v136_v26, %v137_v28  ;;  %v142_v31 = vmax.f32 %v140_v27, %v141_v29 }
 0x182   :  { %v145_v32 = vsub.f32 %v129_v20, %v138_v30  ;;  %v143_v33 = vrot.slane %v142_v31, 1 }
 0x184   :  { %v147_v34 = vmul.f32 1.442695, %v145_v32  ;;  %v144_v35 = vmax.f32 %v142_v31, %v143_v33 }
 0x186   :  { %241 = vpow2.f32 %v147_v34  ;;  %v146_v36 = vsub.f32 %v132_v23, %v144_v35 }
 0x188   :  { %v149_v37 = vmul.f32 1.442695, %v146_v36 }
 0x18a   :  { %243 = vpow2.f32 %v149_v37 }
 0x190   :  { %v242_v38 = vpop.eup %241 }
 0x191   :  { %v151_v39 = vrot.slane %v242_v38, 4 }
 0x193   :  { %v152_v40 = vadd.f32 %v242_v38, %v151_v39 }
 0x194   :  { %v244_v41 = vpop.eup %243 }
 0x195   :  { %v153_v42 = vrot.slane %v152_v40, 2  ;;  %v157_v43 = vrot.slane %v244_v41, 4 }
 0x197   :  { %v158_v44 = vadd.f32 %v244_v41, %v157_v43  ;;  %v154_v45 = vadd.f32 %v153_v42, %v152_v40 }
 0x199   :  { %v159_v46 = vrot.slane %v158_v44, 2  ;;  %v155_v47 = vrot.slane %v154_v45, 1 }
 0x19b   :  { %v160_v48 = vadd.f32 %v159_v46, %v158_v44  ;;  %v156_v49 = vadd.f32 %v155_v47, %v154_v45 }
 0x19d   :  { %v161_v50 = vrot.slane %v160_v48, 1  ;;  %245 = vrcp.f32 %v156_v49 }
 0x19f   :  { %v162_v51 = vadd.f32 %v161_v50, %v160_v48 }
 0x1a1   :  { %247 = vrcp.f32 %v162_v51 }
 0x1a7   :  { %v246_v52 = vpop.eup %245 }
 0x1a8   :  { %v165_v53 = vmul.f32 %v246_v52, %v242_v38 }
 0x1aa   :  { %168 = vst.msk [vmem:[%s363_s5] sm:$0xff] %vm167_vm2, %v165_v53  ;;  %v170_v54 = vmul.f32 %v165_v53, %v319_v5 }
 0x1ab   :  { %v248_v55 = vpop.eup %247 }
 0x1ac   :  { %v166_v56 = vmul.f32 %v248_v55, %v244_v41  ;;  %v172_v57 = vsel %vm33_vm0, %v170_v54, 0.0 }
 0x1ad   :  { %v173_v58 = vrot.slane %v172_v57, 4 }
 0x1ae   :  { %169 = vst.msk [vmem:[%s363_s5 + $0x8] sm:$0xff] %vm167_vm2, %v166_v56  ;;  %v171_v59 = vmul.f32 %v166_v56, %v326_v7  ;;  %s249_s5 = scalar_lea.vmem %s200_s10, 32 }
 0x1af   :  { %v174_v60 = vadd.f32 %v173_v58, %v172_v57  ;;  %p250_p0 = scmp.ne.s32.totalorder %s200_s10, %s249_s5  ;;  %p255_p2 = scmp.lt.s32.totalorder %s249_s5, %s249_s5 }
 0x1b0   :  { %v179_v61 = vsel %vm33_vm0, %v171_v59, 0.0 }
 0x1b1   :  { %v175_v62 = vrot.slane %v174_v60, 2  ;;  %v180_v63 = vrot.slane %v179_v61, 4  ;;  %p256_p3 = por %p255_p2, %p254_p1 }
 0x1b3   :  { %v176_v0 = vadd.f32 %v175_v62, %v174_v60  ;;  %v181_v1 = vadd.f32 %v180_v63, %v179_v61  ;;  %p257_p4 = pnand %p256_p3, %p250_p0 }
 0x1b5   :  { %v182_v2 = vrot.slane %v181_v1, 2  ;;  %v177_v3 = vrot.slane %v176_v0, 1 }
 0x1b7   :  { %v183_v4 = vadd.f32 %v182_v2, %v181_v1  ;;  %v178_v6 = vadd.f32 %v177_v3, %v176_v0 }
 0x1b9   :  { %v184_v5 = vrot.slane %v183_v4, 1 }
 0x1bb   :  { %v185_v8 = vadd.f32 %v184_v5, %v183_v4 }
 0x1bd   :  { %v189_v9 = vsel %vm188_vm3, %v185_v8, %v178_v6 }
 0x1be   :  { %192 = vst.msk [vmem:[#allocation2] sm:$0x3] %vm191_vm4, %v189_v9 }
 0x1bf   :  { %260 = shalt.err (!%p257_p4)
}
 0x1c0   :  { %s261_s13 = scalar_lea.hbm %s362_s4, 32 }
 0x1c1   :  { %p262_p5 = scmp.ne.s32.totalorder %s362_s4, %s261_s13  ;;  %p265_p6 = scmp.lt.u32.totalorder %s261_s13, %s362_s4 }
 0x1c3   :  { %p267_p7 = pnand %p265_p6, %p262_p5 }
 0x1c5   :  { %270 = shalt.err (!%p267_p7)
}
 0x1c6   :  { %202 = dma.vmem_to_hbm [thread:$0]  %s200_s10, 32, %s362_s4, [#allocation3]  }
 0x1c7   :  { %271 = dma.done.wait [#allocation3], 32  }
 0x1c8   :  { %272 = vsyncadd [#allocation3], 4294967264 }
 0x1c9   :  { %210 = vsyncpa [#allocation3], 1 }

</bundles_post_ra>
